<compile_context>
chip_gen: v6e
topology: v6e:2x2x1
jax: 0.10.0
libtpu: 0.0.40
codegen_flags: <defaults>
</compile_context>

<pallas_src>
import jax
import jax.numpy as jnp
from jax.experimental import pallas as pl
from jax.experimental.pallas import tpu as pltpu

_LANES = 512                      # lane-dense last dim (multiple of 128)
_TARGET_BLOCK_BYTES = 2 << 20     # ~2 MiB per block buffer


def _fake_quant_kernel(params_ref, x_ref, o_ref):
    # params_ref: SMEM f32[4] = [lower_bound, upper_bound, s, inv_s]
    lb = params_ref[0]
    ub = params_ref[1]
    s = params_ref[2]
    inv_s = params_ref[3]

    # Compute in f32 regardless of the storage dtype.
    x = x_ref[...].astype(jnp.float32)
    # torch.clamp(min, max) == min(max(x, min), max)  (max wins if min > max)
    c = jnp.minimum(jnp.maximum(x, lb), ub)
    # torch.round -> round half to even; jnp.round matches.
    r = jnp.round((c - lb) * inv_s)
    o_ref[...] = (s * r + lb).astype(o_ref.dtype)


def fake_quantizer_weight_param2(x, lower_bound, upper_bound, n_bit):
    """Apply the fake-quantizer forward to an arbitrary-shaped float tensor x."""
    orig_shape = x.shape
    orig_dtype = x.dtype
    total = x.size

    # --- scalar params (one exact host-side divide; no per-element divide) ---
    lb = jnp.asarray(lower_bound, jnp.float32).reshape(())
    ub = jnp.asarray(upper_bound, jnp.float32).reshape(())
    nb = jnp.asarray(n_bit, jnp.float32).reshape(())
    s = (ub - lb) / nb
    inv_s = nb / (ub - lb)
    params = jnp.stack([lb, ub, s, inv_s])

    # --- flatten + pad to a lane-dense (rows, _LANES) slab ------------------
    itemsize = jnp.dtype(orig_dtype).itemsize
    rows_needed = -(-total // _LANES)                       # ceil div
    tile_r = max(8, (_TARGET_BLOCK_BYTES // (_LANES * itemsize)) // 8 * 8)
    tile_r = min(tile_r, ((rows_needed + 7) // 8) * 8)      # don't exceed data
    rows = ((rows_needed + tile_r - 1) // tile_r) * tile_r  # multiple of tile_r

    flat = x.reshape(-1)
    pad = rows * _LANES - total
    if pad:
        flat = jnp.concatenate([flat, jnp.zeros((pad,), dtype=orig_dtype)])
    x2d = flat.reshape(rows, _LANES)

    grid = (rows // tile_r,)
    out2d = pl.pallas_call(
        _fake_quant_kernel,
        out_shape=jax.ShapeDtypeStruct((rows, _LANES), orig_dtype),
        grid=grid,
        in_specs=[
            pl.BlockSpec(memory_space=pltpu.SMEM),                 # scalar params
            pl.BlockSpec((tile_r, _LANES), lambda i: (i, 0)),      # x tile (VMEM)
        ],
        out_specs=pl.BlockSpec((tile_r, _LANES), lambda i: (i, 0)),
        compiler_params=pltpu.CompilerParams(
            dimension_semantics=("parallel",)),
    )(params, x2d)

    return out2d.reshape(-1)[:total].reshape(orig_shape)


if __name__ == "__main__":
    key = jax.random.PRNGKey(0)
    kx, klb, kub = jax.random.split(key, 3)

    # Module params (randn in __init__); n_bit set to 4 by set_n_bit_manually(4).
    lower_bound = jax.random.normal(klb, (1,), dtype=jnp.float32)
    upper_bound = jax.random.normal(kub, (1,), dtype=jnp.float32)
    # Ensure lb < ub for a sensible quantizer (calibration normally sets these).
    lb = jnp.minimum(lower_bound, upper_bound)
    ub = jnp.maximum(lower_bound, upper_bound) + 1.0
    n_bit = jnp.array([4.0], dtype=jnp.float32)

    # Example "weight" tensor, conv-weight-like NCHW shape.
    x = jax.random.normal(kx, (2, 4, 16, 16), dtype=jnp.float32)

    y = fake_quantizer_weight_param2(x, lb, ub, n_bit)
    y = jax.block_until_ready(y)

    # Pure-JAX reference (matches the PyTorch forward).
    s = (ub[0] - lb[0]) / n_bit[0]
    c = jnp.minimum(jnp.maximum(x, lb[0]), ub[0])
    ref = s * jnp.round((c - lb[0]) / s) + lb[0]
    assert y.dtype == x.dtype, "output dtype must match input dtype"
    assert jnp.allclose(y, ref, atol=1e-5, rtol=1e-5), "mismatch vs reference"

    print("KERNEL_OK")
</pallas_src>

<mosaic_0001>
module attributes {stable_mosaic.version = 11 : i64} {
  func.func @_fake_quant_kernel(%arg0: i32, %arg1: memref<4xf32, #tpu.memory_space<smem>>, %arg2: memref<8x512xf32, #tpu.memory_space<vmem>>, %arg3: memref<8x512xf32, #tpu.memory_space<vmem>>) attributes {dimension_semantics = [#tpu.dimension_semantics<parallel>], iteration_bounds = array<i64: 1>, scalar_prefetch = 0 : i64, scratch_operands = 0 : i64, tpu.core_type = #tpu.core_type<tc>, window_params = [{transform_indices = @transform_0, window_bounds = array<i64: 4>}, {transform_indices = @transform_1, window_bounds = array<i64: 8, 512>}, {transform_indices = @transform_2, window_bounds = array<i64: 8, 512>}]} {
    %c0 = arith.constant 0 : index
    %0 = memref.load %arg1[%c0] : memref<4xf32, #tpu.memory_space<smem>>
    %c1 = arith.constant 1 : index
    %1 = memref.load %arg1[%c1] : memref<4xf32, #tpu.memory_space<smem>>
    %c2 = arith.constant 2 : index
    %2 = memref.load %arg1[%c2] : memref<4xf32, #tpu.memory_space<smem>>
    %c3 = arith.constant 3 : index
    %3 = memref.load %arg1[%c3] : memref<4xf32, #tpu.memory_space<smem>>
    %c0_0 = arith.constant 0 : index
    %c0_1 = arith.constant 0 : index
    %4 = vector.load %arg2[%c0_0, %c0_1] : memref<8x512xf32, #tpu.memory_space<vmem>>, vector<8x512xf32>
    %5 = vector.broadcast %0 : f32 to vector<8x512xf32>
    %6 = arith.maximumf %4, %5 : vector<8x512xf32>
    %7 = vector.broadcast %1 : f32 to vector<8x512xf32>
    %8 = arith.minimumf %6, %7 : vector<8x512xf32>
    %9 = vector.broadcast %0 : f32 to vector<8x512xf32>
    %10 = arith.subf %8, %9 : vector<8x512xf32>
    %11 = vector.broadcast %3 : f32 to vector<8x512xf32>
    %12 = arith.mulf %10, %11 : vector<8x512xf32>
    %13 = math.roundeven %12 : vector<8x512xf32>
    %14 = vector.broadcast %2 : f32 to vector<8x512xf32>
    %15 = arith.mulf %14, %13 : vector<8x512xf32>
    %16 = vector.broadcast %0 : f32 to vector<8x512xf32>
    %17 = arith.addf %15, %16 : vector<8x512xf32>
    %c0_2 = arith.constant 0 : index
    %c0_3 = arith.constant 0 : index
    %18 = vector.load %arg3[%c0_2, %c0_3] : memref<8x512xf32, #tpu.memory_space<vmem>>, vector<8x512xf32>
    tpu.vector_store %arg3[%c0_2, %c0_3], %17 {strides = array<i32>} : memref<8x512xf32, #tpu.memory_space<vmem>>, vector<8x512xf32>,
    return
  }
  func.func @transform_0(%arg0: i32) -> i32 {
    %c0_i32 = arith.constant 0 : i32
    %c0_i32_0 = arith.constant 0 : i32
    return %c0_i32 : i32
  }
  func.func @transform_1(%arg0: i32) -> (i32, i32) {
    %c0_i32 = arith.constant 0 : i32
    %c0_i32_0 = arith.constant 0 : i32
    return %arg0, %c0_i32 : i32, i32
  }
  func.func @transform_2(%arg0: i32) -> (i32, i32) {
    %c0_i32 = arith.constant 0 : i32
    %c0_i32_0 = arith.constant 0 : i32
    return %arg0, %c0_i32 : i32, i32
  }
}

</mosaic_0001>

<bundles_post_ra>
// kernel: tpu_custom_call.1
= control target key start
LH: loop header
LB: loop body
LE: loop exit
PB: predicated region body
PF: predicated region fallthrough
CT: control target
= control target key end

     0   :  { %7 = vsyncpa [#allocation5], 0  ;;  %s240_s0 = inlined_call_operand.hbm [shape: f32[4], index: 0, kind: input, shape index: {}]   ;;  %s241_s1 = inlined_call_operand.hbm [shape: f32[8,512], index: 1, kind: input, shape index: {}]   ;;  %s242_s2 = inlined_call_operand.hbm [shape: f32[8,512], index: 2, kind: output, shape index: {}]  }
   0x1   :  { %8 = vsyncpa [#allocation3], 0 }
   0x2   :  { %9 = vsyncpa [#allocation4], 0  ;;  %s187_s9 = smov [#allocation2]   ;;  %s188_s12 = smov [#allocation6]  }
   0x3   :  { %17 = dma.hbm_to_smem %s240_s0, 16, %s187_s9, [#allocation5]  }
   0x4   :  { %s24_s13 = sshll.u32 %s188_s12, 4  ;;  %s25_s13 = int_to_ptr.vmem [resolvable:$true] %s24_s13 }
   0x5   :  { %s149_s14 = scalar_lea.vmem %s25_s13, 512  ;;  %p154_p1 = scmp.lt.s32.totalorder %s25_s13, %s25_s13 }
   0x6   :  { %p150_p0 = scmp.ne.s32.totalorder %s25_s13, %s149_s14  ;;  %p155_p2 = scmp.lt.s32.totalorder %s149_s14, %s149_s14 }
   0x8   :  { %p156_p3 = por %p155_p2, %p154_p1 }
   0xa   :  { %p157_p4 = pnand %p156_p3, %p150_p0 }
   0xc   :  { %160 = shalt.err (!%p157_p4)
}
   0xd   :  { %27 = dma.hbm_to_vmem [thread:$0]  %s241_s1, 512, %s25_s13, [#allocation3]  }
   0xe   :  { %181 = dma.done.wait [#allocation5], 16  }
   0xf   :  { %182 = vsyncadd [#allocation5], 4294967280 }
  0x10   :  { %183 = dma.done.wait [#allocation3], 512  }
  0x11   :  { %184 = vsyncadd [#allocation3], 4294966784 }
  0x12   :  { %34 = sfence }
  0x13   :  { %s35_s0 = sld [smem:[#allocation2]]  ;;  %v39_v0 = vld [vmem:[#allocation6] sm:$0xff]  ;;  %v40_v1 = vld [vmem:[#allocation6 + $0x8] sm:$0xff]  ;;  %v41_v2 = vld [vmem:[#allocation6 + $0x10] sm:$0xff]  ;;  %s189_s19 = smov [#allocation7]  }
  0x14   :  { %s95_s17 = sld [smem:[#allocation2 + $0x1]]  ;;  %v42_v3 = vld [vmem:[#allocation6 + $0x18] sm:$0xff]  ;;  %s85_s20 = sshll.u32 %s189_s19, 4  ;;  %s86_s20 = int_to_ptr.vmem [resolvable:$true] %s85_s20 }
  0x15   :  { %s97_s18 = sld [smem:[#allocation2 + $0x3]]  ;;  %s161_s21 = scalar_lea.vmem %s86_s20, 512 }
  0x16   :  { %s96_s1 = sld [smem:[#allocation2 + $0x2]]  ;;  %p162_p5 = scmp.ne.s32.totalorder %s86_s20, %s161_s21 }
  0x17   :  { %p166_p6 = scmp.lt.s32.totalorder %s86_s20, %s86_s20  ;;  %p167_p7 = scmp.lt.s32.totalorder %s161_s21, %s161_s21 }
  0x19   :  { %v211_v4 = vstv %s35_s0  ;;  %p168_p8 = por %p167_p7, %p166_p6 }
  0x1a   :  { %v44_v5 = vmax.f32 %v39_v0, %v211_v4  ;;  %v48_v6 = vstv %s95_s17  ;;  %v45_v7 = vmax.f32 %v40_v1, %v211_v4  ;;  %v46_v8 = vmax.f32 %v41_v2, %v211_v4 }
  0x1b   :  { %v47_v9 = vmax.f32 %v42_v3, %v211_v4  ;;  %v57_v13 = vstv %s97_s18  ;;  %p169_p9 = pnand %p168_p8, %p162_p5 }
  0x1c   :  { %v49_v10 = vmin.f32 %v44_v5, %v48_v6  ;;  %v50_v11 = vmin.f32 %v45_v7, %v48_v6  ;;  %v51_v12 = vmin.f32 %v46_v8, %v48_v6  ;;  %v66_v39 = vstv %s96_s1 }
  0x1d   :  { %v52_v14 = vmin.f32 %v47_v9, %v48_v6 }
  0x1e   :  { %v53_v15 = vsub.f32 %v49_v10, %v211_v4  ;;  %v54_v16 = vsub.f32 %v50_v11, %v211_v4  ;;  %v55_v17 = vsub.f32 %v51_v12, %v211_v4 }
  0x1f   :  { %v56_v18 = vsub.f32 %v52_v14, %v211_v4 }
  0x20   :  { %v58_v19 = vmul.f32 %v57_v13, %v53_v15  ;;  %v59_v20 = vmul.f32 %v57_v13, %v54_v16  ;;  %v60_v21 = vmul.f32 %v57_v13, %v55_v17 }
  0x21   :  { %v61_v25 = vmul.f32 %v57_v13, %v56_v18 }
  0x22   :  { %v98_v22 = vand.u32 2147483647, %v58_v19  ;;  %v100_v23 = vcvt.f32.s32 %v58_v19  ;;  %v106_v24 = vand.u32 2147483647, %v59_v20  ;;  %v108_v26 = vcvt.f32.s32 %v59_v20 }
  0x23   :  { %v116_v27 = vcvt.f32.s32 %v60_v21  ;;  %v103_v29 = vand.u32 2147483648, %v58_v19  ;;  %v114_v30 = vand.u32 2147483647, %v60_v21  ;;  %v111_v32 = vand.u32 2147483648, %v59_v20 }
  0x24   :  { %v101_v28 = vcvt.s32.f32 %v100_v23  ;;  %v109_v31 = vcvt.s32.f32 %v108_v26  ;;  %v119_v34 = vand.u32 2147483648, %v60_v21  ;;  %vm221_vm0 = vcmp.lt.f32.partialorder %v98_v22, 8388608.0 }
  0x25   :  { %v117_v33 = vcvt.s32.f32 %v116_v27  ;;  %vm225_vm1 = vcmp.lt.f32.partialorder %v106_v24, 8388608.0  ;;  %v124_v38 = vcvt.f32.s32 %v61_v25  ;;  %v122_v42 = vand.u32 2147483647, %v61_v25 }
  0x26   :  { %v102_v36 = vand.u32 2147483647, %v101_v28  ;;  %v110_v40 = vand.u32 2147483647, %v109_v31  ;;  %vm115_vm2 = vcmp.lt.f32.partialorder %v114_v30, 8388608.0  ;;  %v127_v45 = vand.u32 2147483648, %v61_v25 }
  0x27   :  { %v118_v41 = vand.u32 2147483647, %v117_v33  ;;  %v125_v44 = vcvt.s32.f32 %v124_v38  ;;  %vm123_vm3 = vcmp.lt.f32.partialorder %v122_v42, 8388608.0 }
  0x28   :  { %v104_v43 = vor.u32 %v103_v29, %v102_v36  ;;  %v112_v46 = vor.u32 %v111_v32, %v110_v40 }
  0x29   :  { %v120_v47 = vor.u32 %v119_v34, %v118_v41  ;;  %v126_v49 = vand.u32 2147483647, %v125_v44 }
  0x2a   :  { %v105_v48 = vsel %vm221_vm0, %v104_v43, %v58_v19  ;;  %v113_v51 = vsel %vm225_vm1, %v112_v46, %v59_v20 }
  0x2b   :  { %v67_v50 = vmul.f32 %v105_v48, %v66_v39  ;;  %v121_v52 = vsel %vm115_vm2, %v120_v47, %v60_v21  ;;  %v68_v53 = vmul.f32 %v113_v51, %v66_v39  ;;  %v128_v55 = vor.u32 %v127_v45, %v126_v49 }
  0x2c   :  { %v69_v54 = vmul.f32 %v121_v52, %v66_v39 }
  0x2d   :  { %v71_v56 = vadd.f32 %v67_v50, %v211_v4  ;;  %v72_v57 = vadd.f32 %v68_v53, %v211_v4  ;;  %v129_v59 = vsel %vm123_vm3, %v128_v55, %v61_v25 }
  0x2e   :  { %v73_v58 = vadd.f32 %v69_v54, %v211_v4  ;;  %v70_v60 = vmul.f32 %v129_v59, %v66_v39 }
  0x2f   :  { %75 = vst [vmem:[#allocation7] sm:$0xff] %v71_v56  ;;  %76 = vst [vmem:[#allocation7 + $0x8] sm:$0xff] %v72_v57 }
  0x30   :  { %77 = vst [vmem:[#allocation7 + $0x10] sm:$0xff] %v73_v58  ;;  %v74_v61 = vadd.f32 %v70_v60, %v211_v4 }
  0x32   :  { %78 = vst [vmem:[#allocation7 + $0x18] sm:$0xff] %v74_v61 }
  0x33   :  { %172 = shalt.err (!%p169_p9)
}
  0x34   :  { %88 = dma.vmem_to_hbm [thread:$0]  %s86_s20, 512, %s242_s2, [#allocation4]  }
  0x35   :  { %185 = dma.done.wait [#allocation4], 512  }
  0x36   :  { %186 = vsyncadd [#allocation4], 4294966784 }
  0x37   :  { %92 = vsyncpa [#allocation3], 1 }
  0x38   :  { %93 = vsyncpa [#allocation4], 1 }
  0x39   :  { %94 = vsyncpa [#allocation5], 1 }

</bundles_post_ra>
